<compile_context>
chip_gen: v6e
topology: v6e:2x2x1
jax: 0.10.0
libtpu: 0.0.40
codegen_flags: <defaults>
</compile_context>

<pallas_src>
import functools

import numpy as np

import jax
import jax.numpy as jnp
from jax.experimental import pallas as pl
from jax.experimental.pallas import tpu as pltpu


def _kernel_global_pool(x_ref, w_ref, b_ref, o_ref, *, inv_pool):
    """1x1 conv + bias + ReLU + full-window average (P_out == 1).

    x_ref : (B, C_in, P)    VMEM, bf16
    w_ref : (C_out, C_in)   VMEM, bf16 (grid-resident)
    b_ref : (C_out, 1)      VMEM, f32
    o_ref : (B, 1, C_out)   VMEM, lane-dense over C_out
    """
    w = w_ref[...]
    b = b_ref[...]
    for bi in range(x_ref.shape[0]):                      # static unroll, B is small
        y = jnp.dot(w, x_ref[bi], preferred_element_type=jnp.float32)   # (C_out, P)
        y = jnp.maximum(y + b, 0.0)                                      # bias + ReLU
        pooled = jnp.sum(y, axis=-1, keepdims=True) * inv_pool           # (C_out, 1)
        o_ref[bi] = jnp.transpose(pooled).astype(o_ref.dtype)            # (1, C_out)


def _kernel_sliding_pool(x_ref, w_ref, b_ref, pm_ref, o_ref):
    """1x1 conv + bias + ReLU + stride-1 average pool via pooling matrix.

    x_ref : (B, C_in, P)      VMEM, bf16
    w_ref : (C_out, C_in)     VMEM, bf16
    b_ref : (C_out, 1)        VMEM, f32
    pm_ref: (P, P_out)        VMEM, f32 constant stride-1 average-pool matrix
    o_ref : (B, P_out, C_out) VMEM, lane-dense over C_out
    """
    w = w_ref[...]
    b = b_ref[...]
    pm = pm_ref[...]
    for bi in range(x_ref.shape[0]):
        y = jnp.dot(w, x_ref[bi], preferred_element_type=jnp.float32)   # (C_out, P)
        y = jnp.maximum(y + b, 0.0)
        pooled = jnp.dot(y, pm, preferred_element_type=jnp.float32)     # (C_out, P_out)
        o_ref[bi] = jnp.transpose(pooled).astype(o_ref.dtype)           # (P_out, C_out)


def _make_pool_matrix(H, W, kH, kW):
    """(P, P_out) matrix: column q = (oh*W_out+ow) averages one kHxkW window."""
    H_out, W_out = H - kH + 1, W - kW + 1
    P, P_out = H * W, H_out * W_out
    pm = np.zeros((P, P_out), dtype=np.float32)
    inv = 1.0 / float(kH * kW)
    for oh in range(H_out):
        for ow in range(W_out):
            q = oh * W_out + ow
            for kh in range(kH):
                row = (oh + kh) * W + ow
                pm[row:row + kW, q] = inv
    return jnp.asarray(pm)


def _pick_batch_block(n, cap=8):
    """Largest divisor of n that leaves >= 2 grid steps (both v7x TCs busy)."""
    best = 1
    for d in range(1, min(n // 2, cap) + 1):
        if n % d == 0:
            best = d
    return best


def squeezenet_custom_classifiers(x_nchw, weight, bias, *, kH=13, kW=13,
                                  batch_block=None):
    """x_nchw: (N, C_in, H, W); weight: (C_out, C_in, 1, 1); bias: (C_out,)."""
    N, C_in, H, W = x_nchw.shape
    C_out = weight.shape[0]
    P = H * W
    H_out, W_out = H - kH + 1, W - kW + 1
    P_out = H_out * W_out
    out_dtype = x_nchw.dtype

    if batch_block is None:
        batch_block = _pick_batch_block(N)
    assert N % batch_block == 0, (N, batch_block)

    # Channels-first everywhere: these are pure reshapes, no HBM transpose of x.
    # bf16 inputs halve the dominant HBM traffic; both matmuls accumulate in f32.
    x_ncp = x_nchw.reshape(N, C_in, P).astype(jnp.bfloat16)
    w_mat = weight.reshape(C_out, C_in).astype(jnp.bfloat16)
    b_mat = bias.reshape(C_out, 1).astype(jnp.float32)

    in_specs = [
        pl.BlockSpec((batch_block, C_in, P), lambda n: (n, 0, 0)),
        pl.BlockSpec((C_out, C_in), lambda n: (0, 0)),
        pl.BlockSpec((C_out, 1), lambda n: (0, 0)),
    ]
    args = [x_ncp, w_mat, b_mat]

    if P_out == 1:
        # Canonical 13x13 head: the (P, 1) pool matmul is degenerate on the MXU;
        # use an XLU row reduction and drop the pool-matrix buffer/DMA entirely.
        kernel = functools.partial(_kernel_global_pool,
                                   inv_pool=1.0 / float(kH * kW))
        pool_flops = N * C_out * P
        pm_bytes = 0
    else:
        pool_mat = _make_pool_matrix(H, W, kH, kW)
        in_specs.append(pl.BlockSpec((P, P_out), lambda n: (0, 0)))
        args.append(pool_mat)
        kernel = _kernel_sliding_pool
        pool_flops = 2 * N * C_out * P * P_out
        pm_bytes = int(pool_mat.size) * 4

    flops = 2 * N * C_out * C_in * P + pool_flops
    bytes_accessed = (int(x_ncp.size) * 2 + int(w_mat.size) * 2
                      + int(b_mat.size) * 4 + pm_bytes
                      + N * P_out * C_out * jnp.dtype(out_dtype).itemsize)

    out_npc = pl.pallas_call(
        kernel,
        out_shape=jax.ShapeDtypeStruct((N, P_out, C_out), out_dtype),
        grid_spec=pltpu.PrefetchScalarGridSpec(
            num_scalar_prefetch=0,
            grid=(N // batch_block,),
            in_specs=in_specs,
            out_specs=pl.BlockSpec((batch_block, P_out, C_out),
                                   lambda n: (n, 0, 0)),
        ),
        compiler_params=pltpu.CompilerParams(
            dimension_semantics=("parallel",),        # batch blocks over v7x TCs
            vmem_limit_bytes=32 * 1024 * 1024,
        ),
        cost_estimate=pl.CostEstimate(
            flops=flops, transcendentals=0, bytes_accessed=int(bytes_accessed)),
    )(*args)

    # Tiny output: back to channels-first and unflatten the spatial dim.
    return jnp.transpose(out_npc, (0, 2, 1)).reshape(N, C_out, H_out, W_out)


def _reference(x, weight, bias, kH=13, kW=13):
    C_out, C_in = weight.shape[0], weight.shape[1]
    y = jnp.einsum("nchw,oc->nohw", x, weight.reshape(C_out, C_in))
    y = y + bias[None, :, None, None]
    y = jnp.maximum(y, 0.0)
    y = jax.lax.reduce_window(y, 0.0, jax.lax.add,
                              (1, 1, kH, kW), (1, 1, 1, 1), "VALID")
    return y / float(kH * kW)


if __name__ == "__main__":
    key = jax.random.PRNGKey(0)
    kx, kw, kb, kx2 = jax.random.split(key, 4)

    C_IN = 512              # fixed by the module: Conv2d(512, num_classes, 1)
    NUM_CLASSES = 128       # lane-dense output channel count
    bound = 1.0 / (C_IN ** 0.5)
    weight = jax.random.uniform(
        kw, (NUM_CLASSES, C_IN, 1, 1), dtype=jnp.float32, minval=-bound, maxval=bound)
    bias = jax.random.uniform(
        kb, (NUM_CLASSES,), dtype=jnp.float32, minval=-bound, maxval=bound)

    # Case 1: canonical SqueezeNet head input (13x13 -> 1x1 pooled output).
    x = jax.random.normal(kx, (2, C_IN, 13, 13), dtype=jnp.float32)
    out = jax.block_until_ready(squeezenet_custom_classifiers(x, weight, bias))
    assert out.shape == (2, NUM_CLASSES, 1, 1), out.shape
    ref = _reference(x, weight, bias)
    # bf16 inputs with f32 accumulation: tolerance loosened vs pure-f32.
    assert jnp.allclose(out, ref, atol=3e-2, rtol=3e-2), \
        float(jnp.max(jnp.abs(out - ref)))

    # Case 2: larger spatial map exercises the sliding-window pooling path.
    x2 = jax.random.normal(kx2, (2, C_IN, 15, 15), dtype=jnp.float32)
    out2 = jax.block_until_ready(squeezenet_custom_classifiers(x2, weight, bias))
    assert out2.shape == (2, NUM_CLASSES, 3, 3), out2.shape
    ref2 = _reference(x2, weight, bias)
    assert jnp.allclose(out2, ref2, atol=3e-2, rtol=3e-2), \
        float(jnp.max(jnp.abs(out2 - ref2)))

    print("KERNEL_OK")
</pallas_src>

<mosaic_0001>
module attributes {stable_mosaic.version = 11 : i64} {
  func.func @_kernel_global_pool(%arg0: i32, %arg1: memref<1x512x169xbf16, #tpu.memory_space<vmem>>, %arg2: memref<128x512xbf16, #tpu.memory_space<vmem>>, %arg3: memref<128x1xf32, #tpu.memory_space<vmem>>, %arg4: memref<1x1x128xf32, #tpu.memory_space<vmem>>) attributes {dimension_semantics = [#tpu.dimension_semantics<parallel>], iteration_bounds = array<i64: 2>, scalar_prefetch = 0 : i64, scratch_operands = 0 : i64, tpu.core_type = #tpu.core_type<tc>, window_params = [{transform_indices = @transform_0, window_bounds = array<i64: 1, 512, 169>}, {pipeline_mode = #tpu.pipeline_mode<synchronous>, transform_indices = @transform_1, window_bounds = array<i64: 128, 512>}, {pipeline_mode = #tpu.pipeline_mode<synchronous>, transform_indices = @transform_2, window_bounds = array<i64: 128, 1>}, {transform_indices = @transform_3, window_bounds = array<i64: 1, 1, 128>}]} {
    %c0 = arith.constant 0 : index
    %c0_0 = arith.constant 0 : index
    %0 = vector.load %arg2[%c0, %c0_0] : memref<128x512xbf16, #tpu.memory_space<vmem>>, vector<128x512xbf16>
    %c0_1 = arith.constant 0 : index
    %c0_2 = arith.constant 0 : index
    %1 = vector.load %arg3[%c0_1, %c0_2] : memref<128x1xf32, #tpu.memory_space<vmem>>, vector<128x1xf32>
    %c0_3 = arith.constant 0 : index
    %c0_4 = arith.constant 0 : index
    %c0_5 = arith.constant 0 : index
    %2 = vector.load %arg1[%c0_3, %c0_4, %c0_5] : memref<1x512x169xbf16, #tpu.memory_space<vmem>>, vector<1x512x169xbf16>
    %3 = vector.shape_cast %2 : vector<1x512x169xbf16> to vector<512x169xbf16>
    %cst = arith.constant dense<0.000000e+00> : vector<128x169xf32>
    %4 = tpu.matmul %0, %3, %cst {dimension_numbers = #tpu.dot_dimension_numbers<[1], [0], [0], [1], [0, 0, 1, 1], [], []>} : vector<128x512xbf16>, vector<512x169xbf16>, vector<128x169xf32> -> vector<128x169xf32>
    %5 = vector.broadcast %1 : vector<128x1xf32> to vector<128x169xf32>
    %6 = arith.addf %4, %5 : vector<128x169xf32>
    %cst_6 = arith.constant 0.000000e+00 : f32
    %7 = vector.broadcast %cst_6 : f32 to vector<128x169xf32>
    %8 = arith.maximumf %6, %7 : vector<128x169xf32>
    %cst_7 = arith.constant dense<0.000000e+00> : vector<128xf32>
    %9 = vector.multi_reduction <add>, %8, %cst_7 [1] : vector<128x169xf32> to vector<128xf32>
    %10 = vector.shape_cast %9 : vector<128xf32> to vector<128x1xf32>
    %cst_8 = arith.constant 5.917160e-03 : f32
    %11 = vector.broadcast %cst_8 : f32 to vector<128x1xf32>
    %12 = arith.mulf %10, %11 : vector<128x1xf32>
    %13 = tpu.transpose %12, [1, 0] : vector<128x1xf32> -> vector<1x128xf32>
    %c0_9 = arith.constant 0 : index
    %c0_10 = arith.constant 0 : index
    %c0_11 = arith.constant 0 : index
    %14 = vector.load %arg4[%c0_9, %c0_10, %c0_11] : memref<1x1x128xf32, #tpu.memory_space<vmem>>, vector<1x1x128xf32>
    %15 = vector.shape_cast %14 : vector<1x1x128xf32> to vector<1x128xf32>
    %16 = vector.shape_cast %13 : vector<1x128xf32> to vector<1x1x128xf32>
    tpu.vector_store %arg4[%c0_9, %c0_10, %c0_11], %16 {strides = array<i32>} : memref<1x1x128xf32, #tpu.memory_space<vmem>>, vector<1x1x128xf32>,
    return
  }
  func.func @transform_0(%arg0: i32) -> (i32, i32, i32) {
    %c0_i32 = arith.constant 0 : i32
    %c0_i32_0 = arith.constant 0 : i32
    %c0_i32_1 = arith.constant 0 : i32
    return %arg0, %c0_i32, %c0_i32_0 : i32, i32, i32
  }
  func.func @transform_1(%arg0: i32) -> (i32, i32) {
    %c0_i32 = arith.constant 0 : i32
    %c0_i32_0 = arith.constant 0 : i32
    %c0_i32_1 = arith.constant 0 : i32
    return %c0_i32, %c0_i32_0 : i32, i32
  }
  func.func @transform_2(%arg0: i32) -> (i32, i32) {
    %c0_i32 = arith.constant 0 : i32
    %c0_i32_0 = arith.constant 0 : i32
    %c0_i32_1 = arith.constant 0 : i32
    return %c0_i32, %c0_i32_0 : i32, i32
  }
  func.func @transform_3(%arg0: i32) -> (i32, i32, i32) {
    %c0_i32 = arith.constant 0 : i32
    %c0_i32_0 = arith.constant 0 : i32
    %c0_i32_1 = arith.constant 0 : i32
    return %arg0, %c0_i32, %c0_i32_0 : i32, i32, i32
  }
}

</mosaic_0001>

<bundles_post_ra>
// kernel: tpu_custom_call.1
= control target key start
LH: loop header
LB: loop body
LE: loop exit
PB: predicated region body
PF: predicated region fallthrough
CT: control target
= control target key end

     0   :  { %8 = vsyncpa [#allocation3], 0  ;;  %s1975_s0 = inlined_call_operand.vmem [shape: bf16[2,512,169], index: 0, kind: input, shape index: {}]   ;;  %s1976_s1 = inlined_call_operand.vmem [shape: bf16[128,512], index: 1, kind: input, shape index: {}]   ;;  %s1977_s2 = inlined_call_operand.vmem [shape: f32[128,1], index: 2, kind: input, shape index: {}]   ;;  %s1978_s3 = inlined_call_operand.hbm [shape: f32[2,1,128], index: 3, kind: output, shape index: {}]  }
   0x1   :  { %10 = vsyncpa [#allocation3 + $0x1], 0  ;;  %s1656_s12 = smov 0   ;;  %s1658_s13 = smov 0  }
   0x2   :  { %s1660_s14 = smov 0   ;;  %s1662_s15 = smov 0  }
   0x3 LB: > { %s1677_s16 = sadd.s32 4294967295, %s1632_s15   ;;  %s1280_s17 = sadd.s32 4294967294, %s1632_s15   ;;  %s1632_s15 = sphi %s1662_s15, %s1984_s15   ;;  %s1628_s14 = sphi %s1660_s14, %s1983_s14   ;;  %s1624_s13 = sphi %s1658_s13, %s1982_s13   ;;  %s1620_s12 = sphi %s1656_s12, %s1981_s12  }
   0x4   : > { %s1681_s18 = sadd.s32 1, %s1632_s15   ;;  %s91_s19 = sadd.s32 1, %s1628_s14 }
   0x5   : > { %s88_s20 = ssub.s32 %s1632_s15, %s1681_s18  ;;  %p101_p0 = scmp.ne.s32.totalorder %s1628_s14, %s1624_s13 }
   0x6   : > { %p89_p1 = scmp.eq.s32.totalorder %s88_s20, 0  ;;  %p102_p2 = scmp.eq.s32.totalorder %s1677_s16, 1 }
   0x7   : > { %p107_p3 = scmp.ne.s32.totalorder %s1624_s13, %s1620_s12  ;;  %p108_p4 = scmp.eq.s32.totalorder %s1280_s17, 1 }
   0x8   : > { %s1692_s21 = scalar_select %p89_p1, %s1628_s14, %s91_s19  }
   0x9   : > { %p1694_p5 = por %p102_p2, %p101_p0  ;;  %p1698_p6 = por %p108_p4, %p107_p3 }
   0xa   : > { %p1283_p7 = scmp.ge.s32.totalorder %s1632_s15, 1  ;;  %p140_p8 = scmp.lt.s32.totalorder %s1632_s15, 3 }
   0xc   : > { %p141_p9 = pnand %p1283_p7, %p140_p8 }
   0xd   : > { %p163_p10 = scmp.lt.s32.totalorder (!%p141_p9), %s1677_s16, 1  ;;  %s161_s8 = sand.u32 (!%p141_p9), 1, %s1624_s13  }
   0xe   : > { %144 = sbr.rel (%p141_p9) target bundleno = 570 (0x23a), region = 32  ;;  %s162_s9 = scalar_lea.vmem (!%p141_p9), [#allocation2], %s161_s8 }
   0xf   : > { %s1225_s10 = sshll.u32 (!%p141_p9), %s162_s9, 4  ;;  %s1382_s11 = sshll.u32 (!%p141_p9), %s1677_s16, 4  ;;  %s1937_s10 = int_to_ptr.vmem [resolvable:$true] %s1225_s10 }
  0x10   : > { %s1223_s20 = scalar_lea.hbm (!%p141_p9), %s1978_s3, %s1382_s11  ;;  %s1213_s24 = scalar_lea.sflag (!%p141_p9), [#allocation3], %s161_s8 }
  0x11   : > { %s1572_s25 = scalar_lea.vmem (!%p141_p9), %s1937_s10, 16 }
  0x12   : > { %p1573_p11 = scmp.ne.s32.totalorder (!%p141_p9), %s1937_s10, %s1572_s25 }
  0x13   : > { %v1526_v0 = vld [vmem:[%s1976_s1 + $0x4] ss:$16 sps:$4 sm:$0xff]   ;;  %v1634_v1 = vmov 0   ;;  %s164_s26 = scalar_select %p163_p10, %s1677_s16, 1  ;;  %v1529_v2 = vld [vmem:[%s1976_s1 + $0xc] ss:$16 sps:$4 sm:$0xff]  }
  0x14   : > { %1426 = vset.pattern.permute.xlu0 %v1634_v1  ;;  %1427 = vset.pattern.permute.xlu1 %v1634_v1  ;;  %v200_v60 = vld [vmem:[%s1977_s2] sm:$0xff]  ;;  %v201_v63 = vld [vmem:[%s1977_s2 + $0x8] sm:$0xff]  ;;  %vm1098_vm0 = vcmask 334848   ;;  %p1574_p12 = pnand %p1573_p11, %p1694_p5 }
  0x15   : > { %872 = vmatprep.mubr.bf16.mxu0 %v1526_v0  ;;  %s1385_s29 = sshll.u32 %s164_s26, 9  ;;  %985 = vmatprep.mubr.bf16.mxu1 %v1529_v2  ;;  %v202_v2 = vld [vmem:[%s1977_s2 + $0x10] sm:$0xff]  ;;  %s1635_s26 = smov [#allocation2]  }
  0x16   : > { %s1715_s5 = scalar_lea.vmem %s1975_s0, %s1385_s29  ;;  %282 = vperm.xlu0 %1426, %v200_v60   ;;  %292 = vperm.xlu1 %1427, %v202_v2   ;;  %p1575_p13 = pneg %p1574_p12 }
  0x17   : > { %v1428_v3 = vld [vmem:[%s1715_s5 + $0x74] ss:$8 sps:$4 sm:$0xff]   ;;  %v1432_v5 = vld [vmem:[%s1715_s5 + $0x70] ss:$8 sps:$4 sm:$0xff]   ;;  %v1434_v7 = vld [vmem:[%s1715_s5 + $0x64] ss:$8 sps:$4 sm:$0xff]  }
  0x18   : > { %v1430_v4 = vld [vmem:[%s1715_s5 + $0x174] ss:$8 sps:$4 sm:$0xff]   ;;  %840 = vmatprep.subr.bf16.mxu0 %v1428_v3  ;;  %v1433_v6 = vld [vmem:[%s1715_s5 + $0x170] ss:$8 sps:$4 sm:$0xff]   ;;  %v1436_v8 = vld [vmem:[%s1715_s5 + $0x164] ss:$8 sps:$4 sm:$0xff]  }
  0x19   : > { %953 = vmatprep.subr.bf16.mxu1 %v1430_v4  ;;  %841 = vmatpush1.bf16.msra.mxu0 %v1432_v5  ;;  %v1438_v9 = vld [vmem:[%s1715_s5 + $0x60] ss:$8 sps:$4 sm:$0xff]   ;;  %v1440_v11 = vld [vmem:[%s1715_s5 + $0x54] ss:$8 sps:$4 sm:$0xff]   ;;  %v1444_v13 = vld [vmem:[%s1715_s5 + $0x50] ss:$8 sps:$4 sm:$0xff]  }
  0x1a   : > { %954 = vmatpush1.bf16.msra.mxu1 %v1433_v6  ;;  %842 = vmatprep.subr.bf16.mxu0 %v1434_v7  ;;  %v1439_v10 = vld [vmem:[%s1715_s5 + $0x160] ss:$8 sps:$4 sm:$0xff]   ;;  %v1442_v12 = vld [vmem:[%s1715_s5 + $0x154] ss:$8 sps:$4 sm:$0xff]   ;;  %v1445_v14 = vld [vmem:[%s1715_s5 + $0x150] ss:$8 sps:$4 sm:$0xff]  }
  0x1b   : > { %955 = vmatprep.subr.bf16.mxu1 %v1436_v8  ;;  %v1446_v15 = vld [vmem:[%s1715_s5 + $0x44] ss:$8 sps:$4 sm:$0xff]   ;;  %v1450_v17 = vld [vmem:[%s1715_s5 + $0x40] ss:$8 sps:$4 sm:$0xff]   ;;  %v1452_v19 = vld [vmem:[%s1715_s5 + $0x34] ss:$8 sps:$4 sm:$0xff]   ;;  %287 = vperm.xlu0 %1426, %v201_v63  }
  0x1c   : > { %v1448_v16 = vld [vmem:[%s1715_s5 + $0x144] ss:$8 sps:$4 sm:$0xff]   ;;  %v1451_v18 = vld [vmem:[%s1715_s5 + $0x140] ss:$8 sps:$4 sm:$0xff]   ;;  %v1454_v20 = vld [vmem:[%s1715_s5 + $0x134] ss:$8 sps:$4 sm:$0xff]  }
  0x1d   : > { %843 = vmatpush1.bf16.msra.mxu0 %v1438_v9  ;;  %v1456_v21 = vld [vmem:[%s1715_s5 + $0x30] ss:$8 sps:$4 sm:$0xff]   ;;  %v1458_v23 = vld [vmem:[%s1715_s5 + $0x24] ss:$8 sps:$4 sm:$0xff]   ;;  %v1462_v25 = vld [vmem:[%s1715_s5 + $0x20] ss:$8 sps:$4 sm:$0xff]  }
  0x1e   : > { %956 = vmatpush1.bf16.msra.mxu1 %v1439_v10  ;;  %844 = vmatprep.subr.bf16.mxu0 %v1440_v11  ;;  %v1457_v22 = vld [vmem:[%s1715_s5 + $0x130] ss:$8 sps:$4 sm:$0xff]   ;;  %v1460_v24 = vld [vmem:[%s1715_s5 + $0x124] ss:$8 sps:$4 sm:$0xff]   ;;  %v1463_v26 = vld [vmem:[%s1715_s5 + $0x120] ss:$8 sps:$4 sm:$0xff]  }
  0x1f   : > { %957 = vmatprep.subr.bf16.mxu1 %v1442_v12  ;;  %v1464_v27 = vld [vmem:[%s1715_s5 + $0x14] ss:$8 sps:$4 sm:$0xff]   ;;  %v1468_v29 = vld [vmem:[%s1715_s5 + $0x10] ss:$8 sps:$4 sm:$0xff]   ;;  %v1470_v31 = vld [vmem:[%s1715_s5 + $0x4] ss:$8 sps:$4 sm:$0xff]  }
  0x20   : > { %v1466_v28 = vld [vmem:[%s1715_s5 + $0x114] ss:$8 sps:$4 sm:$0xff]   ;;  %v1469_v30 = vld [vmem:[%s1715_s5 + $0x110] ss:$8 sps:$4 sm:$0xff]   ;;  %v1472_v32 = vld [vmem:[%s1715_s5 + $0x104] ss:$8 sps:$4 sm:$0xff]  }
  0x21   : > { %845 = vmatpush1.bf16.msra.mxu0 %v1444_v13  ;;  %v1474_v33 = vld [vmem:[%s1715_s5] ss:$8 sps:$4 sm:$0xff]   ;;  %v1476_v35 = vld [vmem:[%s1715_s5 + $0xf4] ss:$8 sps:$4 sm:$0xff]   ;;  %v1480_v37 = vld [vmem:[%s1715_s5 + $0xf0] ss:$8 sps:$4 sm:$0xff]  }
  0x22   : > { %958 = vmatpush1.bf16.msra.mxu1 %v1445_v14  ;;  %846 = vmatprep.subr.bf16.mxu0 %v1446_v15  ;;  %v1475_v34 = vld [vmem:[%s1715_s5 + $0x100] ss:$8 sps:$4 sm:$0xff]   ;;  %v1478_v36 = vld [vmem:[%s1715_s5 + $0x1f4] ss:$8 sps:$4 sm:$0xff]   ;;  %v1481_v38 = vld [vmem:[%s1715_s5 + $0x1f0] ss:$8 sps:$4 sm:$0xff]  }
  0x23   : > { %959 = vmatprep.subr.bf16.mxu1 %v1448_v16  ;;  %v1482_v39 = vld [vmem:[%s1715_s5 + $0xe4] ss:$8 sps:$4 sm:$0xff]   ;;  %v1486_v41 = vld [vmem:[%s1715_s5 + $0xe0] ss:$8 sps:$4 sm:$0xff]   ;;  %v1488_v43 = vld [vmem:[%s1715_s5 + $0xd4] ss:$8 sps:$4 sm:$0xff]  }
  0x24   : > { %v1484_v40 = vld [vmem:[%s1715_s5 + $0x1e4] ss:$8 sps:$4 sm:$0xff]   ;;  %v1487_v42 = vld [vmem:[%s1715_s5 + $0x1e0] ss:$8 sps:$4 sm:$0xff]   ;;  %v1490_v44 = vld [vmem:[%s1715_s5 + $0x1d4] ss:$8 sps:$4 sm:$0xff]  }
  0x25   : > { %847 = vmatpush1.bf16.msra.mxu0 %v1450_v17  ;;  %v1492_v45 = vld [vmem:[%s1715_s5 + $0xd0] ss:$8 sps:$4 sm:$0xff]   ;;  %v1494_v47 = vld [vmem:[%s1715_s5 + $0xc4] ss:$8 sps:$4 sm:$0xff]   ;;  %v1498_v49 = vld [vmem:[%s1715_s5 + $0xc0] ss:$8 sps:$4 sm:$0xff]  }
  0x26   : > { %960 = vmatpush1.bf16.msra.mxu1 %v1451_v18  ;;  %848 = vmatprep.subr.bf16.mxu0 %v1452_v19  ;;  %v1493_v46 = vld [vmem:[%s1715_s5 + $0x1d0] ss:$8 sps:$4 sm:$0xff]   ;;  %v1496_v48 = vld [vmem:[%s1715_s5 + $0x1c4] ss:$8 sps:$4 sm:$0xff]   ;;  %v1499_v50 = vld [vmem:[%s1715_s5 + $0x1c0] ss:$8 sps:$4 sm:$0xff]  }
  0x27   : > { %961 = vmatprep.subr.bf16.mxu1 %v1454_v20  ;;  %v1500_v51 = vld [vmem:[%s1715_s5 + $0xb4] ss:$8 sps:$4 sm:$0xff]   ;;  %v1504_v53 = vld [vmem:[%s1715_s5 + $0xb0] ss:$8 sps:$4 sm:$0xff]   ;;  %v1506_v55 = vld [vmem:[%s1715_s5 + $0xa4] ss:$8 sps:$4 sm:$0xff]  }
  0x28   : > { %v1502_v52 = vld [vmem:[%s1715_s5 + $0x1b4] ss:$8 sps:$4 sm:$0xff]   ;;  %v1505_v54 = vld [vmem:[%s1715_s5 + $0x1b0] ss:$8 sps:$4 sm:$0xff]   ;;  %v1508_v56 = vld [vmem:[%s1715_s5 + $0x1a4] ss:$8 sps:$4 sm:$0xff]  }
  0x29   : > { %849 = vmatpush1.bf16.msra.mxu0 %v1456_v21  ;;  %v1510_v57 = vld [vmem:[%s1715_s5 + $0xa0] ss:$8 sps:$4 sm:$0xff]   ;;  %v1512_v59 = vld [vmem:[%s1715_s5 + $0x94] ss:$8 sps:$4 sm:$0xff]   ;;  %v1516_v62 = vld [vmem:[%s1715_s5 + $0x90] ss:$8 sps:$4 sm:$0xff]  }
  0x2a   : > { %962 = vmatpush1.bf16.msra.mxu1 %v1457_v22  ;;  %850 = vmatprep.subr.bf16.mxu0 %v1458_v23  ;;  %v1511_v58 = vld [vmem:[%s1715_s5 + $0x1a0] ss:$8 sps:$4 sm:$0xff]   ;;  %v1514_v61 = vld [vmem:[%s1715_s5 + $0x194] ss:$8 sps:$4 sm:$0xff]   ;;  %v1517_v0 = vld [vmem:[%s1715_s5 + $0x190] ss:$8 sps:$4 sm:$0xff]  }
  0x2b   : > { %963 = vmatprep.subr.bf16.mxu1 %v1460_v24  ;;  %v1518_v1 = vld [vmem:[%s1715_s5 + $0x84] ss:$8 sps:$4 sm:$0xff]   ;;  %v203_v5 = vld [vmem:[%s1977_s2 + $0x18] sm:$0xff]  ;;  %v1522_v6 = vld [vmem:[%s1715_s5 + $0x80] ss:$8 sps:$4 sm:$0xff]   ;;  %s1576_s27 = sshll.u32 %s1635_s26, 4  ;;  %s1577_s27 = int_to_ptr.vmem [resolvable:$false] %s1576_s27 }
  0x2c   : > { %v1520_v3 = vld [vmem:[%s1715_s5 + $0x184] ss:$8 sps:$4 sm:$0xff]   ;;  %v1523_v7 = vld [vmem:[%s1715_s5 + $0x180] ss:$8 sps:$4 sm:$0xff]   ;;  %297 = vperm.xlu1 %1427, %v203_v5   ;;  %v206_v10 = vld [vmem:[%s1977_s2 + $0x30] sm:$0xff]  ;;  %s1578_s16 = scalar_lea.vmem %s1577_s27, 32  ;;  %p1579_p0 = scmp.lt.s32.totalorder %s1937_s10, %s1577_s27 }
  0x2d   : > { %851 = vmatpush1.bf16.msra.mxu0 %v1462_v25  ;;  %v204_v4 = vld [vmem:[%s1977_s2 + $0x20] sm:$0xff]  ;;  %v1527_v9 = vld [vmem:[%s1976_s1 + $0x8] ss:$16 sps:$4 sm:$0xff]   ;;  %v1532_v13 = vld [vmem:[%s1976_s1 + $0x2c] ss:$16 sps:$4 sm:$0xff]   ;;  %p1580_p1 = scmp.lt.s32.totalorder %s1578_s16, %s1572_s25 }
  0x2e   : > { %964 = vmatpush1.bf16.msra.mxu1 %v1463_v26  ;;  %852 = vmatprep.subr.bf16.mxu0 %v1464_v27  ;;  %v1524_v8 = vld [vmem:[%s1976_s1] ss:$16 sps:$4 sm:$0xff]   ;;  %v205_v11 = vld [vmem:[%s1977_s2 + $0x28] sm:$0xff]  ;;  %v1530_v12 = vld [vmem:[%s1976_s1 + $0x24] ss:$16 sps:$4 sm:$0xff]  }
  0x2f   : > { %965 = vmatprep.subr.bf16.mxu1 %v1466_v28  ;;  %302 = vperm.xlu0 %1426, %v204_v4   ;;  %v208_v14 = vld [vmem:[%s1977_s2 + $0x40] sm:$0xff]  ;;  %v207_v15 = vld [vmem:[%s1977_s2 + $0x38] sm:$0xff]  ;;  %v210_v18 = vld [vmem:[%s1977_s2 + $0x50] sm:$0xff]  ;;  %p1581_p2 = por %p1580_p1, %p1579_p0 }
  0x30   : > { %307 = vperm.xlu1 %1427, %v205_v11   ;;  %v1534_v16 = vld [vmem:[%s1976_s1 + $0x20] ss:$16 sps:$4 sm:$0xff]   ;;  %v1535_v17 = vld [vmem:[%s1976_s1 + $0x28] ss:$16 sps:$4 sm:$0xff]   ;;  %v1536_v20 = vld [vmem:[%s1976_s1 + $0x44] ss:$16 sps:$4 sm:$0xff]  }
  0x31   : > { %853 = vmatpush1.bf16.msra.mxu0 %v1468_v29  ;;  %v209_v19 = vld [vmem:[%s1977_s2 + $0x48] sm:$0xff]  ;;  %v212_v22 = vld [vmem:[%s1977_s2 + $0x60] sm:$0xff]  ;;  %v211_v23 = vld [vmem:[%s1977_s2 + $0x58] sm:$0xff]  ;;  %p1582_p3 = pnand %p1581_p2, %p1575_p13 }
  0x32   : > { %966 = vmatpush1.bf16.msra.mxu1 %v1469_v30  ;;  %854 = vmatprep.subr.bf16.mxu0 %v1470_v31  ;;  %v1538_v21 = vld [vmem:[%s1976_s1 + $0x4c] ss:$16 sps:$4 sm:$0xff]   ;;  %v1540_v24 = vld [vmem:[%s1976_s1 + $0x40] ss:$16 sps:$4 sm:$0xff]   ;;  %v1541_v25 = vld [vmem:[%s1976_s1 + $0x48] ss:$16 sps:$4 sm:$0xff]  }
  0x33   : > { %967 = vmatprep.subr.bf16.mxu1 %v1472_v32  ;;  %312 = vperm.xlu0 %1426, %v206_v10   ;;  %v214_v26 = vld [vmem:[%s1977_s2 + $0x70] sm:$0xff]  ;;  %v213_v27 = vld [vmem:[%s1977_s2 + $0x68] sm:$0xff]  ;;  %v215_v30 = vld [vmem:[%s1977_s2 + $0x78] sm:$0xff] }
  0x34   : > { %317 = vperm.xlu1 %1427, %v207_v15   ;;  %v1542_v28 = vld [vmem:[%s1976_s1 + $0x64] ss:$16 sps:$4 sm:$0xff]   ;;  %v1544_v29 = vld [vmem:[%s1976_s1 + $0x6c] ss:$16 sps:$4 sm:$0xff]   ;;  %v1546_v31 = vld [vmem:[%s1976_s1 + $0x60] ss:$16 sps:$4 sm:$0xff]  }
  0x35   : > { %855 = vmatpush1.bf16.msra.mxu0 %v1474_v33  ;;  %v1547_v32 = vld [vmem:[%s1976_s1 + $0x68] ss:$16 sps:$4 sm:$0xff]   ;;  %v1548_v33 = vld [vmem:[%s1976_s1 + $0x84] ss:$16 sps:$4 sm:$0xff]  }
  0x36   : > { %968 = vmatpush1.bf16.msra.mxu1 %v1475_v34  ;;  %856 = vmatprep.subr.bf16.mxu0 %v1476_v35  ;;  %v1550_v34 = vld [vmem:[%s1976_s1 + $0x8c] ss:$16 sps:$4 sm:$0xff]   ;;  %v1552_v35 = vld [vmem:[%s1976_s1 + $0x80] ss:$16 sps:$4 sm:$0xff]  }
  0x37   : > { %969 = vmatprep.subr.bf16.mxu1 %v1478_v36  ;;  %322 = vperm.xlu0 %1426, %v208_v14   ;;  %v1553_v36 = vld [vmem:[%s1976_s1 + $0x88] ss:$16 sps:$4 sm:$0xff]  }
  0x38   : > { %327 = vperm.xlu1 %1427, %v209_v19  }
  0x39   : > { %857 = vmatpush2.bf16.msra.mxu0 %v1480_v37  ;;  %v1554_v37 = vld [vmem:[%s1976_s1 + $0xa4] ss:$16 sps:$4 sm:$0xff]  }
  0x3a   : > { %970 = vmatpush2.bf16.msra.mxu1 %v1481_v38  ;;  %858 = vmatprep.subr.bf16.mxu0 %v1482_v39  ;;  %v1556_v38 = vld [vmem:[%s1976_s1 + $0xac] ss:$16 sps:$4 sm:$0xff]   ;;  %v1558_v39 = vld [vmem:[%s1976_s1 + $0xa0] ss:$16 sps:$4 sm:$0xff]  }
  0x3b   : > { %971 = vmatprep.subr.bf16.mxu1 %v1484_v40  ;;  %332 = vperm.xlu0 %1426, %v210_v18   ;;  %v1559_v40 = vld [vmem:[%s1976_s1 + $0xa8] ss:$16 sps:$4 sm:$0xff]  }
  0x3c   : > { %337 = vperm.xlu1 %1427, %v211_v23  }
  0x3d   : > { %859 = vmatpush2.bf16.msra.mxu0 %v1486_v41  ;;  %v1560_v41 = vld [vmem:[%s1976_s1 + $0xc4] ss:$16 sps:$4 sm:$0xff]  }
  0x3e   : > { %972 = vmatpush2.bf16.msra.mxu1 %v1487_v42  ;;  %860 = vmatprep.subr.bf16.mxu0 %v1488_v43  ;;  %v1562_v42 = vld [vmem:[%s1976_s1 + $0xcc] ss:$16 sps:$4 sm:$0xff]   ;;  %v1564_v43 = vld [vmem:[%s1976_s1 + $0xc0] ss:$16 sps:$4 sm:$0xff]  }
  0x3f   : > { %973 = vmatprep.subr.bf16.mxu1 %v1490_v44  ;;  %342 = vperm.xlu0 %1426, %v212_v22   ;;  %v1565_v44 = vld [vmem:[%s1976_s1 + $0xc8] ss:$16 sps:$4 sm:$0xff]  }
  0x40   : > { %347 = vperm.xlu1 %1427, %v213_v27  }
  0x41   : > { %861 = vmatpush2.bf16.msra.mxu0 %v1492_v45  ;;  %v1566_v45 = vld [vmem:[%s1976_s1 + $0xe4] ss:$16 sps:$4 sm:$0xff]  }
  0x42   : > { %974 = vmatpush2.bf16.msra.mxu1 %v1493_v46  ;;  %862 = vmatprep.subr.bf16.mxu0 %v1494_v47  ;;  %v1568_v46 = vld [vmem:[%s1976_s1 + $0xec] ss:$16 sps:$4 sm:$0xff]   ;;  %v1570_v47 = vld [vmem:[%s1976_s1 + $0xe0] ss:$16 sps:$4 sm:$0xff]  }
  0x43   : > { %975 = vmatprep.subr.bf16.mxu1 %v1496_v48  ;;  %352 = vperm.xlu0 %1426, %v214_v26   ;;  %v1571_v48 = vld [vmem:[%s1976_s1 + $0xe8] ss:$16 sps:$4 sm:$0xff]  }
  0x44   : > { %357 = vperm.xlu1 %1427, %v215_v30  }
  0x45   : > { %863 = vmatpush2.bf16.msra.mxu0 %v1498_v49 }
  0x46   : > { %976 = vmatpush2.bf16.msra.mxu1 %v1499_v50  ;;  %864 = vmatprep.subr.bf16.mxu0 %v1500_v51 }
  0x47   : > { %977 = vmatprep.subr.bf16.mxu1 %v1502_v52 }
  0x49   : > { %865 = vmatpush2.bf16.msra.mxu0 %v1504_v53 }
  0x4a   : > { %978 = vmatpush2.bf16.msra.mxu1 %v1505_v54  ;;  %866 = vmatprep.subr.bf16.mxu0 %v1506_v55 }
  0x4b   : > { %979 = vmatprep.subr.bf16.mxu1 %v1508_v56 }
  0x4d   : > { %867 = vmatpush2.bf16.msra.mxu0 %v1510_v57 }
  0x4e   : > { %980 = vmatpush2.bf16.msra.mxu1 %v1511_v58  ;;  %868 = vmatprep.subr.bf16.mxu0 %v1512_v59 }
  0x4f   : > { %981 = vmatprep.subr.bf16.mxu1 %v1514_v61 }
  0x51   : > { %869 = vmatpush2.bf16.msra.mxu0 %v1516_v62 }
  0x52   : > { %982 = vmatpush2.bf16.msra.mxu1 %v1517_v0  ;;  %870 = vmatprep.subr.bf16.mxu0 %v1518_v1 }
  0x53   : > { %983 = vmatprep.subr.bf16.mxu1 %v1520_v3 }
  0x55   : > { %871 = vmatpush2.bf16.msra.mxu0 %v1522_v6 }
  0x56   : > { %984 = vmatpush2.bf16.msra.mxu1 %v1523_v7 }
  0x58   : > { %873 = vmatmul.mubr.bf16.vlgmr.msra.gmra.mxu0 %v1524_v8 }
  0x59   : > { %986 = vmatmul.mubr.bf16.vlgmr.msra.gmra.mxu1 %v1527_v9  ;;  %882 = vmatprep.mubr.bf16.mxu0 %v1530_v12 }
  0x5a   : > { %995 = vmatprep.mubr.bf16.mxu1 %v1532_v13 }
  0x60   : > { %883 = vmatmul.mubr.bf16.gmra.mxu0 %v1534_v16 }
  0x61   : > { %996 = vmatmul.mubr.bf16.gmra.mxu1 %v1535_v17  ;;  %892 = vmatprep.mubr.bf16.mxu0 %v1536_v20 }
  0x62   : > { %1005 = vmatprep.mubr.bf16.mxu1 %v1538_v21 }
  0x68   : > { %893 = vmatmul.mubr.bf16.gmra.mxu0 %v1540_v24 }
  0x69   : > { %1006 = vmatmul.mubr.bf16.gmra.mxu1 %v1541_v25  ;;  %902 = vmatprep.mubr.bf16.mxu0 %v1542_v28 }
  0x6a   : > { %1015 = vmatprep.mubr.bf16.mxu1 %v1544_v29 }
  0x70   : > { %903 = vmatmul.mubr.bf16.gmra.mxu0 %v1546_v31 }
  0x71   : > { %1016 = vmatmul.mubr.bf16.gmra.mxu1 %v1547_v32  ;;  %912 = vmatprep.mubr.bf16.mxu0 %v1548_v33 }
  0x72   : > { %1025 = vmatprep.mubr.bf16.mxu1 %v1550_v34 }
  0x78   : > { %913 = vmatmul.mubr.bf16.gmra.mxu0 %v1552_v35 }
  0x79   : > { %1026 = vmatmul.mubr.bf16.gmra.mxu1 %v1553_v36  ;;  %922 = vmatprep.mubr.bf16.mxu0 %v1554_v37 }
  0x7a   : > { %1035 = vmatprep.mubr.bf16.mxu1 %v1556_v38 }
  0x80   : > { %923 = vmatmul.mubr.bf16.gmra.mxu0 %v1558_v39 }
  0x81   : > { %1036 = vmatmul.mubr.bf16.gmra.mxu1 %v1559_v40  ;;  %932 = vmatprep.mubr.bf16.mxu0 %v1560_v41 }
  0x82   : > { %1045 = vmatprep.mubr.bf16.mxu1 %v1562_v42 }
  0x88   : > { %933 = vmatmul.mubr.bf16.gmra.mxu0 %v1564_v43 }
  0x89   : > { %1046 = vmatmul.mubr.bf16.gmra.mxu1 %v1565_v44  ;;  %942 = vmatprep.mubr.bf16.mxu0 %v1566_v45 }
  0x8a   : > { %1055 = vmatprep.mubr.bf16.mxu1 %v1568_v46 }
  0x90   : > { %943 = vmatmul.mubr.bf16.gmra.mxu0 %v1570_v47 }
  0x91   : > { %1056 = vmatmul.mubr.bf16.gmra.mxu1 %v1571_v48  ;;  %v283_v49 = vpop.permute.xlu0 %282  ;;  %v293_v60 = vpop.permute.xlu1 %292 }
  0x96   : > { %v288_v55 = vpop.permute.xlu0 %287 }
  0xa7   : > { %v298_v13 = vpop.permute.xlu1 %297 }
  0xaa   : > { %v303_v26 = vpop.permute.xlu0 %302 }
  0xab   : > { %v308_v39 = vpop.permute.xlu1 %307 }
 0x118   : > { %v874_v50 = vpop.f32.mrf.mxu0 }
 0x119   : > { %v987_v51 = vpop.f32.mrf.mxu1  ;;  %v875_v52 = vadd.f32 %v874_v50, %v283_v49 }
 0x11a   : > { %v876_v53 = vpop.f32.mrf.mxu0 }
 0x11b   : > { %v989_v54 = vpop.f32.mrf.mxu1  ;;  %v877_v56 = vadd.f32 %v876_v53, %v283_v49  ;;  %v988_v57 = vadd.f32 %v987_v51, %v875_v52  ;;  %v313_v52 = vpop.permute.xlu0 %312 }
 0x11c   : > { %v878_v58 = vpop.f32.mrf.mxu0 }
 0x11d   : > { %v991_v59 = vpop.f32.mrf.mxu1  ;;  %v990_v61 = vadd.f32 %v989_v54, %v877_v56  ;;  %v879_v62 = vadd.f32 %v878_v58, %v288_v55  ;;  %v1066_v3 = vmax.f32 %v988_v57, 0.0 }
 0x11e   : > { %v880_v63 = vpop.f32.mrf.mxu0 }
 0x11f   : > { %v993_v0 = vpop.f32.mrf.mxu1  ;;  %v1067_v1 = vmax.f32 %v990_v61, 0.0  ;;  %v881_v2 = vadd.f32 %v880_v63, %v288_v55  ;;  %v992_v4 = vadd.f32 %v991_v59, %v879_v62 }
 0x120   : > { %v884_v5 = vpop.f32.mrf.mxu0 }
 0x121   : > { %v997_v6 = vpop.f32.mrf.mxu1  ;;  %v994_v7 = vadd.f32 %v993_v0, %v881_v2  ;;  %v885_v8 = vadd.f32 %v884_v5, %v293_v60  ;;  %v1099_v9 = vsel %vm1098_vm0, %v1067_v1, 0.0  ;;  %v1068_v16 = vmax.f32 %v992_v4, 0.0  ;;  %v318_v1 = vpop.permute.xlu1 %317 }
 0x122   : > { %v886_v10 = vpop.f32.mrf.mxu0  ;;  %v1100_v12 = vadd.f32 %v1099_v9, %v1066_v3 }
 0x123   : > { %v999_v11 = vpop.f32.mrf.mxu1  ;;  %v1069_v14 = vmax.f32 %v994_v7, 0.0  ;;  %v887_v15 = vadd.f32 %v886_v10, %v293_v60  ;;  %v998_v17 = vadd.f32 %v997_v6, %v885_v8 }
 0x124   : > { %v888_v18 = vpop.f32.mrf.mxu0  ;;  %1101 = vadd.xlane.f32.xlu0 %v1100_v12 }
 0x125   : > { %v1001_v19 = vpop.f32.mrf.mxu1  ;;  %v1000_v20 = vadd.f32 %v999_v11, %v887_v15  ;;  %v889_v21 = vadd.f32 %v888_v18, %v298_v13  ;;  %v1103_v22 = vsel %vm1098_vm0, %v1069_v14, 0.0  ;;  %v1070_v29 = vmax.f32 %v998_v17, 0.0  ;;  %v323_v14 = vpop.permute.xlu0 %322 }
 0x126   : > { %v890_v23 = vpop.f32.mrf.mxu0  ;;  %v1104_v25 = vadd.f32 %v1103_v22, %v1068_v16 }
 0x127   : > { %v1003_v24 = vpop.f32.mrf.mxu1  ;;  %v1071_v27 = vmax.f32 %v1000_v20, 0.0  ;;  %v891_v28 = vadd.f32 %v890_v23, %v298_v13  ;;  %v1002_v30 = vadd.f32 %v1001_v19, %v889_v21 }
 0x128   : > { %v894_v31 = vpop.f32.mrf.mxu0  ;;  %1105 = vadd.xlane.f32.xlu1 %v1104_v25 }
 0x129   : > { %v1007_v32 = vpop.f32.mrf.mxu1  ;;  %v1004_v33 = vadd.f32 %v1003_v24, %v891_v28  ;;  %v895_v34 = vadd.f32 %v894_v31, %v303_v26  ;;  %v1107_v35 = vsel %vm1098_vm0, %v1071_v27, 0.0  ;;  %v1072_v42 = vmax.f32 %v1002_v30, 0.0  ;;  %v328_v27 = vpop.permute.xlu1 %327 }
 0x12a   : > { %v896_v36 = vpop.f32.mrf.mxu0  ;;  %v1108_v38 = vadd.f32 %v1107_v35, %v1070_v29 }
 0x12b   : > { %v1009_v37 = vpop.f32.mrf.mxu1  ;;  %v1073_v40 = vmax.f32 %v1004_v33, 0.0  ;;  %v897_v41 = vadd.f32 %v896_v36, %v303_v26  ;;  %v1008_v43 = vadd.f32 %v1007_v32, %v895_v34 }
 0x12c   : > { %v898_v44 = vpop.f32.mrf.mxu0  ;;  %1109 = vadd.xlane.f32.xlu0 %v1108_v38 }
 0x12d   : > { %v1011_v45 = vpop.f32.mrf.mxu1  ;;  %v1010_v46 = vadd.f32 %v1009_v37, %v897_v41  ;;  %v899_v47 = vadd.f32 %v898_v44, %v308_v39  ;;  %v1111_v48 = vsel %vm1098_vm0, %v1073_v40, 0.0  ;;  %v1074_v55 = vmax.f32 %v1008_v43, 0.0  ;;  %v333_v40 = vpop.permute.xlu0 %332 }
 0x12e   : > { %v900_v49 = vpop.f32.mrf.mxu0  ;;  %v1112_v51 = vadd.f32 %v1111_v48, %v1072_v42 }
 0x12f   : > { %v1013_v50 = vpop.f32.mrf.mxu1  ;;  %v1075_v53 = vmax.f32 %v1010_v46, 0.0  ;;  %v901_v54 = vadd.f32 %v900_v49, %v308_v39  ;;  %v1012_v56 = vadd.f32 %v1011_v45, %v899_v47 }
 0x130   : > { %v904_v57 = vpop.f32.mrf.mxu0  ;;  %1113 = vadd.xlane.f32.xlu0 %v1112_v51 }
 0x131   : > { %v1017_v58 = vpop.f32.mrf.mxu1  ;;  %v1014_v59 = vadd.f32 %v1013_v50, %v901_v54  ;;  %v905_v60 = vadd.f32 %v904_v57, %v313_v52  ;;  %v1115_v61 = vsel %vm1098_vm0, %v1075_v53, 0.0  ;;  %v1076_v4 = vmax.f32 %v1012_v56, 0.0  ;;  %v338_v53 = vpop.permute.xlu1 %337 }
 0x132   : > { %v906_v62 = vpop.f32.mrf.mxu0  ;;  %v1116_v0 = vadd.f32 %v1115_v61, %v1074_v55 }
 0x133   : > { %v1019_v63 = vpop.f32.mrf.mxu1  ;;  %v1077_v2 = vmax.f32 %v1014_v59, 0.0  ;;  %v907_v3 = vadd.f32 %v906_v62, %v313_v52  ;;  %v1018_v5 = vadd.f32 %v1017_v58, %v905_v60 }
 0x134   : > { %v908_v6 = vpop.f32.mrf.mxu0  ;;  %1117 = vadd.xlane.f32.xlu1 %v1116_v0 }
 0x135   : > { %v1021_v7 = vpop.f32.mrf.mxu1  ;;  %v1020_v8 = vadd.f32 %v1019_v63, %v907_v3  ;;  %v909_v9 = vadd.f32 %v908_v6, %v318_v1  ;;  %v1119_v10 = vsel %vm1098_vm0, %v1077_v2, 0.0  ;;  %v1078_v17 = vmax.f32 %v1018_v5, 0.0  ;;  %v343_v2 = vpop.permute.xlu0 %342 }
 0x136   : > { %v910_v11 = vpop.f32.mrf.mxu0  ;;  %v1120_v13 = vadd.f32 %v1119_v10, %v1076_v4 }
 0x137   : > { %v1023_v12 = vpop.f32.mrf.mxu1  ;;  %v1079_v15 = vmax.f32 %v1020_v8, 0.0  ;;  %v911_v16 = vadd.f32 %v910_v11, %v318_v1  ;;  %v1022_v18 = vadd.f32 %v1021_v7, %v909_v9 }
 0x138   : > { %v914_v19 = vpop.f32.mrf.mxu0  ;;  %1121 = vadd.xlane.f32.xlu0 %v1120_v13 }
 0x139   : > { %v1027_v20 = vpop.f32.mrf.mxu1  ;;  %v1024_v21 = vadd.f32 %v1023_v12, %v911_v16  ;;  %v915_v22 = vadd.f32 %v914_v19, %v323_v14  ;;  %v1123_v23 = vsel %vm1098_vm0, %v1079_v15, 0.0  ;;  %v1080_v30 = vmax.f32 %v1022_v18, 0.0  ;;  %v348_v15 = vpop.permute.xlu1 %347 }
 0x13a   : > { %v916_v24 = vpop.f32.mrf.mxu0  ;;  %v1124_v26 = vadd.f32 %v1123_v23, %v1078_v17 }
 0x13b   : > { %v1029_v25 = vpop.f32.mrf.mxu1  ;;  %v1081_v28 = vmax.f32 %v1024_v21, 0.0  ;;  %v917_v29 = vadd.f32 %v916_v24, %v323_v14  ;;  %v1028_v31 = vadd.f32 %v1027_v20, %v915_v22 }
 0x13c   : > { %v918_v32 = vpop.f32.mrf.mxu0  ;;  %1125 = vadd.xlane.f32.xlu1 %v1124_v26 }
 0x13d   : > { %v1031_v33 = vpop.f32.mrf.mxu1  ;;  %v1030_v34 = vadd.f32 %v1029_v25, %v917_v29  ;;  %v919_v35 = vadd.f32 %v918_v32, %v328_v27  ;;  %v1127_v36 = vsel %vm1098_vm0, %v1081_v28, 0.0  ;;  %v1082_v43 = vmax.f32 %v1028_v31, 0.0  ;;  %v353_v28 = vpop.permute.xlu0 %352 }
 0x13e   : > { %v920_v37 = vpop.f32.mrf.mxu0  ;;  %v1128_v39 = vadd.f32 %v1127_v36, %v1080_v30 }
 0x13f   : > { %v1033_v38 = vpop.f32.mrf.mxu1  ;;  %v1083_v41 = vmax.f32 %v1030_v34, 0.0  ;;  %v921_v42 = vadd.f32 %v920_v37, %v328_v27  ;;  %v1032_v44 = vadd.f32 %v1031_v33, %v919_v35 }
 0x140   : > { %v924_v45 = vpop.f32.mrf.mxu0  ;;  %1129 = vadd.xlane.f32.xlu0 %v1128_v39 }
 0x141   : > { %v1037_v46 = vpop.f32.mrf.mxu1  ;;  %v1034_v47 = vadd.f32 %v1033_v38, %v921_v42  ;;  %v925_v48 = vadd.f32 %v924_v45, %v333_v40  ;;  %v1131_v49 = vsel %vm1098_vm0, %v1083_v41, 0.0  ;;  %v1084_v56 = vmax.f32 %v1032_v44, 0.0  ;;  %v358_v41 = vpop.permute.xlu1 %357 }
 0x142   : > { %v926_v50 = vpop.f32.mrf.mxu0  ;;  %v1132_v52 = vadd.f32 %v1131_v49, %v1082_v43 }
 0x143   : > { %v1039_v51 = vpop.f32.mrf.mxu1  ;;  %v1085_v54 = vmax.f32 %v1034_v47, 0.0  ;;  %v927_v55 = vadd.f32 %v926_v50, %v333_v40  ;;  %v1038_v57 = vadd.f32 %v1037_v46, %v925_v48 }
 0x144   : > { %v928_v58 = vpop.f32.mrf.mxu0  ;;  %1133 = vadd.xlane.f32.xlu1 %v1132_v52 }
 0x145   : > { %v1041_v59 = vpop.f32.mrf.mxu1  ;;  %v1040_v60 = vadd.f32 %v1039_v51, %v927_v55  ;;  %v929_v61 = vadd.f32 %v928_v58, %v338_v53  ;;  %v1135_v62 = vsel %vm1098_vm0, %v1085_v54, 0.0  ;;  %v1086_v5 = vmax.f32 %v1038_v57, 0.0 }
 0x146   : > { %v930_v63 = vpop.f32.mrf.mxu0  ;;  %v1136_v1 = vadd.f32 %v1135_v62, %v1084_v56 }
 0x147   : > { %v1043_v0 = vpop.f32.mrf.mxu1  ;;  %v1087_v3 = vmax.f32 %v1040_v60, 0.0  ;;  %v931_v4 = vadd.f32 %v930_v63, %v338_v53  ;;  %v1042_v6 = vadd.f32 %v1041_v59, %v929_v61 }
 0x148   : > { %v934_v7 = vpop.f32.mrf.mxu0  ;;  %1137 = vadd.xlane.f32.xlu0 %v1136_v1 }
 0x149   : > { %v1047_v8 = vpop.f32.mrf.mxu1  ;;  %v1044_v9 = vadd.f32 %v1043_v0, %v931_v4  ;;  %v935_v10 = vadd.f32 %v934_v7, %v343_v2  ;;  %v1139_v11 = vsel %vm1098_vm0, %v1087_v3, 0.0  ;;  %v1088_v18 = vmax.f32 %v1042_v6, 0.0 }
 0x14a   : > { %v936_v12 = vpop.f32.mrf.mxu0  ;;  %v1140_v14 = vadd.f32 %v1139_v11, %v1086_v5 }
 0x14b   : > { %v1049_v13 = vpop.f32.mrf.mxu1  ;;  %v1089_v16 = vmax.f32 %v1044_v9, 0.0  ;;  %v937_v17 = vadd.f32 %v936_v12, %v343_v2  ;;  %v1048_v19 = vadd.f32 %v1047_v8, %v935_v10 }
 0x14c   : > { %v938_v20 = vpop.f32.mrf.mxu0  ;;  %1141 = vadd.xlane.f32.xlu1 %v1140_v14 }
 0x14d   : > { %v1051_v21 = vpop.f32.mrf.mxu1  ;;  %v1050_v22 = vadd.f32 %v1049_v13, %v937_v17  ;;  %v939_v23 = vadd.f32 %v938_v20, %v348_v15  ;;  %v1143_v24 = vsel %vm1098_vm0, %v1089_v16, 0.0  ;;  %v1090_v31 = vmax.f32 %v1048_v19, 0.0 }
 0x14e   : > { %v940_v25 = vpop.f32.mrf.mxu0  ;;  %v1144_v27 = vadd.f32 %v1143_v24, %v1088_v18 }
 0x14f   : > { %v1053_v26 = vpop.f32.mrf.mxu1  ;;  %v1091_v29 = vmax.f32 %v1050_v22, 0.0  ;;  %v941_v30 = vadd.f32 %v940_v25, %v348_v15  ;;  %v1052_v32 = vadd.f32 %v1051_v21, %v939_v23 }
 0x150   : > { %v944_v33 = vpop.f32.mrf.mxu0  ;;  %1145 = vadd.xlane.f32.xlu0 %v1144_v27 }
 0x151   : > { %v1057_v34 = vpop.f32.mrf.mxu1  ;;  %v1054_v35 = vadd.f32 %v1053_v26, %v941_v30  ;;  %v945_v36 = vadd.f32 %v944_v33, %v353_v28  ;;  %v1147_v37 = vsel %vm1098_vm0, %v1091_v29, 0.0  ;;  %v1092_v44 = vmax.f32 %v1052_v32, 0.0 }
 0x152   : > { %v946_v38 = vpop.f32.mrf.mxu0  ;;  %v1148_v40 = vadd.f32 %v1147_v37, %v1090_v31 }
 0x153   : > { %v1059_v39 = vpop.f32.mrf.mxu1  ;;  %v1093_v42 = vmax.f32 %v1054_v35, 0.0  ;;  %v947_v43 = vadd.f32 %v946_v38, %v353_v28  ;;  %v1058_v45 = vadd.f32 %v1057_v34, %v945_v36 }
 0x154   : > { %v948_v46 = vpop.f32.mrf.mxu0  ;;  %1149 = vadd.xlane.f32.xlu1 %v1148_v40 }
 0x155   : > { %v1061_v47 = vpop.f32.mrf.mxu1  ;;  %v1060_v48 = vadd.f32 %v1059_v39, %v947_v43  ;;  %v949_v49 = vadd.f32 %v948_v46, %v358_v41  ;;  %v1151_v50 = vsel %vm1098_vm0, %v1093_v42, 0.0  ;;  %v1094_v55 = vmax.f32 %v1058_v45, 0.0 }
 0x156   : > { %v950_v51 = vpop.f32.mrf.mxu0  ;;  %v1152_v52 = vadd.f32 %v1151_v50, %v1092_v44 }
 0x157   : > { %v1095_v53 = vmax.f32 %v1060_v48, 0.0  ;;  %v951_v54 = vadd.f32 %v950_v51, %v358_v41  ;;  %v1062_v56 = vadd.f32 %v1061_v47, %v949_v49  ;;  %v1063_v57 = vpop.f32.mrf.mxu1 }
 0x158   : > { %1153 = vadd.xlane.f32.xlu0 %v1152_v52 }
 0x159   : > { %v1064_v58 = vadd.f32 %v1063_v57, %v951_v54  ;;  %v1155_v59 = vsel %vm1098_vm0, %v1095_v53, 0.0  ;;  %v1096_v62 = vmax.f32 %v1062_v56, 0.0 }
 0x15a   : > { %v1156_v60 = vadd.f32 %v1155_v59, %v1094_v55 }
 0x15b   : > { %v1097_v61 = vmax.f32 %v1064_v58, 0.0 }
 0x15c   : > { %1157 = vadd.xlane.f32.xlu1 %v1156_v60 }
 0x15d   : > { %v1159_v63 = vsel %vm1098_vm0, %v1097_v61, 0.0 }
 0x15e   : > { %v1160_v0 = vadd.f32 %v1159_v63, %v1096_v62 }
 0x160   : > { %1161 = vadd.xlane.f32.xlu0 %v1160_v0 }
 0x1ad   : > { %v1102_v1 = vpop.xlane.xlu0 %1101 }
 0x1ae   : > { %v1163_v2 = vmul.f32 0.00591716, %v1102_v1 }
 0x1b0   : > { %1179 = vxpose.xlu1.b32.start [1/16] (narrow) %v1163_v2, 8 }
 0x1b1   : > { %v1106_v3 = vpop.xlane.xlu1 %1105 }
 0x1b2   : > { %v1164_v4 = vmul.f32 0.00591716, %v1106_v3 }
 0x1b4   : > { %1180 = vxpose.xlu1.b32.cont [2/16] (narrow) %v1164_v4, 8 }
 0x1b5   : > { %v1110_v5 = vpop.xlane.xlu0 %1109 }
 0x1b6   : > { %v1165_v6 = vmul.f32 0.00591716, %v1110_v5 }
 0x1b8   : > { %1181 = vxpose.xlu1.b32.cont [3/16] (narrow) %v1165_v6, 8 }
 0x1b9   : > { %v1114_v7 = vpop.xlane.xlu0 %1113 }
 0x1ba   : > { %v1166_v8 = vmul.f32 0.00591716, %v1114_v7 }
 0x1bc   : > { %1182 = vxpose.xlu1.b32.cont [4/16] (narrow) %v1166_v8, 8 }
 0x1bd   : > { %v1118_v9 = vpop.xlane.xlu1 %1117 }
 0x1be   : > { %v1167_v10 = vmul.f32 0.00591716, %v1118_v9 }
 0x1c0   : > { %1183 = vxpose.xlu1.b32.cont [5/16] (narrow) %v1167_v10, 8 }
 0x1c1   : > { %v1122_v11 = vpop.xlane.xlu0 %1121 }
 0x1c2   : > { %v1168_v12 = vmul.f32 0.00591716, %v1122_v11 }
 0x1c4   : > { %1184 = vxpose.xlu1.b32.cont [6/16] (narrow) %v1168_v12, 8 }
 0x1c5   : > { %v1126_v13 = vpop.xlane.xlu1 %1125 }
 0x1c6   : > { %v1169_v14 = vmul.f32 0.00591716, %v1126_v13 }
 0x1c8   : > { %1185 = vxpose.xlu1.b32.cont [7/16] (narrow) %v1169_v14, 8 }
 0x1c9   : > { %v1130_v15 = vpop.xlane.xlu0 %1129 }
 0x1ca   : > { %v1170_v16 = vmul.f32 0.00591716, %v1130_v15 }
 0x1cc   : > { %1186 = vxpose.xlu1.b32.cont [8/16] (narrow) %v1170_v16, 8 }
 0x1cd   : > { %v1134_v17 = vpop.xlane.xlu1 %1133 }
 0x1ce   : > { %v1171_v18 = vmul.f32 0.00591716, %v1134_v17 }
 0x1d0   : > { %1187 = vxpose.xlu1.b32.cont [9/16] (narrow) %v1171_v18, 8 }
 0x1d1   : > { %v1138_v19 = vpop.xlane.xlu0 %1137 }
 0x1d2   : > { %v1172_v20 = vmul.f32 0.00591716, %v1138_v19 }
 0x1d4   : > { %1188 = vxpose.xlu1.b32.cont [10/16] (narrow) %v1172_v20, 8 }
 0x1d5   : > { %v1142_v21 = vpop.xlane.xlu1 %1141 }
 0x1d6   : > { %v1173_v22 = vmul.f32 0.00591716, %v1142_v21 }
 0x1d8   : > { %1189 = vxpose.xlu1.b32.cont [11/16] (narrow) %v1173_v22, 8 }
 0x1d9   : > { %v1146_v23 = vpop.xlane.xlu0 %1145 }
 0x1da   : > { %v1174_v24 = vmul.f32 0.00591716, %v1146_v23 }
 0x1dc   : > { %1190 = vxpose.xlu1.b32.cont [12/16] (narrow) %v1174_v24, 8 }
 0x1dd   : > { %v1150_v25 = vpop.xlane.xlu1 %1149 }
 0x1de   : > { %v1175_v26 = vmul.f32 0.00591716, %v1150_v25 }
 0x1e0   : > { %1191 = vxpose.xlu1.b32.cont [13/16] (narrow) %v1175_v26, 8 }
 0x1e1   : > { %v1154_v27 = vpop.xlane.xlu0 %1153 }
 0x1e2   : > { %v1176_v28 = vmul.f32 0.00591716, %v1154_v27 }
 0x1e4   : > { %1192 = vxpose.xlu1.b32.cont [14/16] (narrow) %v1176_v28, 8 }
 0x1e5   : > { %v1158_v29 = vpop.xlane.xlu1 %1157 }
 0x1e6   : > { %v1177_v30 = vmul.f32 0.00591716, %v1158_v29 }
 0x1e8   : > { %1193 = vxpose.xlu1.b32.cont [15/16] (narrow) %v1177_v30, 8 }
 0x1e9   : > { %v1162_v31 = vpop.xlane.xlu0 %1161 }
 0x1ea   : > { %v1178_v32 = vmul.f32 0.00591716, %v1162_v31 }
 0x1ec   : > { %1194 = vxpose.xlu1.b32.end [16/16] (narrow) %v1178_v32, 8 }
 0x22c   : > { %v1195_v33 = vpop.trf.xlu1 }
 0x22d   : > { %1211 = vst [vmem:[%s162_s9] sm:$0x1] %v1195_v33 }
 0x22e   : > { %1585 = shalt.err (!%p1582_p3)
}
 0x22f   : > { %s1586_s28 = scalar_lea.hbm %s1223_s20, 16  ;;  %s1590_s4 = scalar_lea.hbm %s1978_s3, 32 }
 0x230   : > { %p1587_p4 = scmp.ne.s32.totalorder %s1223_s20, %s1586_s28  ;;  %p1591_p9 = scmp.lt.s32.totalorder %s1223_s20, %s1978_s3 }
 0x231   : > { %p1592_p10 = scmp.lt.s32.totalorder %s1590_s4, %s1586_s28 }
 0x232   : > { %p1588_p7 = pnand %p1587_p4, %p1694_p5 }
 0x233   : > { %p1593_p11 = por %p1592_p10, %p1591_p9 }
 0x234   : > { %p1589_p8 = pneg %p1588_p7 }
 0x236   : > { %p1594_p12 = pnand %p1593_p11, %p1589_p8 }
 0x238   : > { %1597 = shalt.err (!%p1594_p12)
}
 0x239   : > { %1386 = dma.vmem_to_hbm [thread:$0]  (%p1694_p5), %s1937_s10, 16, %s1223_s20, %s1213_s24  }
 0x23a PF: > { %p1392_p13 = scmp.ge.s32.totalorder %s1632_s15, 2  ;;  %s1237_s7 = sand.u32 1, %s1620_s12  }
 0x23b   : > { %s1238_s8 = scalar_lea.sflag [#allocation3], %s1237_s7 }
 0x23c   : > { %p1389_p0 = pnand %p1392_p13, %p1698_p6 }
 0x23e   : > { %p1390_p1 = pneg %p1389_p0 }
 0x240   : > { %1615 = dma.done.wait (%p1390_p1), %s1238_s8, 16  }
 0x241   : > { %1617 = vsyncadd (%p1390_p1), %s1238_s8, 4294967280  ;;  %p13_p2 = scmp.ge.s32.totalorder %s1681_s18, 4   ;;  %s1981_s12 = smov %s1624_s13 }
 0x242   : > { %s1982_s13 = smov %s1628_s14  ;;  %s1983_s14 = smov %s1692_s21 }
 0x243   : > { %s1984_s15 = smov %s1681_s18  ;;  %15 = sbr.rel (!%p13_p2) target bundleno = 3 (0x3), region = 67 }
 0x248   :  { %1242 = vsyncpa [#allocation3], 1 }
 0x249   :  { %1244 = vsyncpa [#allocation3 + $0x1], 1 }

</bundles_post_ra>
